<compile_context>
chip_gen: v5e
topology: v5e:2x2
jax: 0.10.0
libtpu: 0.0.40
codegen_flags: <defaults>
</compile_context>

<pallas_src>
import functools

import jax
import jax.numpy as jnp
from jax import lax
from jax.experimental import pallas as pl
from jax.experimental.pallas import tpu as pltpu

LANE = 128          # lane width (last-dim granularity)
BF16_SUBLANE = 16   # min second-to-last tile for bf16 operands


def _round_up(n, m):
    return ((n + m - 1) // m) * m


def _pad2d(a, rows, cols, dtype):
    out = jnp.zeros((rows, cols), dtype)
    return out.at[: a.shape[0], : a.shape[1]].set(a.astype(dtype))


# ----------------------------- Pallas kernel ------------------------------ #
def _gcn_kernel(x_ref, a_ref, w1_ref, w2_ref, w3_ref, b_ref, p_ref,
                out_ref, h_a, h_b, *, n_real, tm):
    """Grid = (layer 0..2, A row tile).

    x_ref  : (Np, Fp) bf16   node features (resident)
    a_ref  : (tm, Np) bf16   row tile of D^-1/2 (A+I) D^-1/2 (pipelined)
    w*_ref : (Fp|Hp, Hp) bf16 layer weights (resident)
    b_ref  : (8,  Hp) f32    rows 0..2 hold b1..b3 (resident)
    p_ref  : (Bp, tm) bf16   column tile of the mean-pooling matrix
    out_ref: (Bp, Hp) f32    pooled graph embeddings (resident accumulator)
    h_a/h_b: (Np, Hp) bf16   full activations after layers 1 / 2 (scratch)
    """
    l = pl.program_id(0)   # layer
    r = pl.program_id(1)   # row tile

    @pl.when(jnp.logical_and(l == 0, r == 0))
    def _():
        out_ref[...] = jnp.zeros_like(out_ref)

    row0 = pl.multiple_of(r * tm, tm)
    # Mask padded node rows so downstream reads never rely on zero-column
    # invariants of A / P.
    valid = (lax.broadcasted_iota(jnp.int32, (tm, 1), 0) + row0) < n_real
    a_tile = a_ref[...]                                        # (tm, Np) bf16

    def conv(h_prev, w_ref, b_row):
        # GCNConv, aggregate-first order: (A_tile @ H_prev) @ W + b, ReLU.
        # bf16 operands, f32 MXU accumulation; bias + ReLU in f32 (VPU-safe).
        agg = jnp.dot(a_tile, h_prev, preferred_element_type=jnp.float32)
        t = jnp.dot(agg.astype(jnp.bfloat16), w_ref[...],
                    preferred_element_type=jnp.float32)
        t = jnp.maximum(t + b_ref[b_row:b_row + 1, :], 0.0)
        return jnp.where(valid, t, 0.0).astype(jnp.bfloat16)

    @pl.when(l == 0)
    def _():
        h_a[pl.ds(row0, tm), :] = conv(x_ref[...], w1_ref, 0)

    @pl.when(l == 1)
    def _():
        h_b[pl.ds(row0, tm), :] = conv(h_a[...], w2_ref, 1)

    @pl.when(l == 2)
    def _():
        h3 = conv(h_b[...], w3_ref, 2)
        # Fused segment_csr(..., 'mean') epilogue: accumulate partial
        # P_tile @ h3_tile into the resident pooled output.
        out_ref[...] += jnp.dot(p_ref[...], h3,
                                preferred_element_type=jnp.float32)


# -------------------------- one-time preparation --------------------------- #
def prepare_params(params):
    """Pad/cast static layer weights ONCE; pack the 3 biases into one tile."""
    (w1, b1), (w2, b2), (w3, b3) = params
    F, H = w1.shape
    Fp, Hp = _round_up(F, LANE), _round_up(H, LANE)
    b_all = jnp.zeros((8, Hp), jnp.float32)
    b_all = b_all.at[0, :H].set(b1.reshape(-1))
    b_all = b_all.at[1, :H].set(b2.reshape(-1))
    b_all = b_all.at[2, :H].set(b3.reshape(-1))
    return dict(
        w1=_pad2d(w1, Fp, Hp, jnp.bfloat16),
        w2=_pad2d(w2, Hp, Hp, jnp.bfloat16),
        w3=_pad2d(w3, Hp, Hp, jnp.bfloat16),
        b=b_all, n_feat=int(F), n_hidden=int(H))


def prepare_graph(a_hat, pool):
    """Pad/cast per-graph-batch operands ONCE (cache & reuse across forwards)."""
    N = a_hat.shape[0]
    B = pool.shape[0]
    Np = _round_up(N, LANE)
    Bp = _round_up(B, BF16_SUBLANE)
    return dict(
        a=_pad2d(a_hat, Np, Np, jnp.bfloat16),
        p=_pad2d(pool, Bp, Np, jnp.bfloat16),
        n_nodes=int(N), n_graphs=int(B))


# ------------------------------- forward ----------------------------------- #
@functools.partial(jax.jit,
                   static_argnames=("n_nodes", "n_feat", "n_hidden", "n_graphs"))
def _gcn_forward_padded(x, a_p, p_p, w1_p, w2_p, w3_p, b_all,
                        *, n_nodes, n_feat, n_hidden, n_graphs):
    Np = a_p.shape[0]
    Fp, Hp = w1_p.shape
    Bp = p_p.shape[0]

    # Only per-call-varying padding left inside the hot path.
    x_p = jnp.zeros((Np, Fp), jnp.bfloat16)
    x_p = x_p.at[:n_nodes, :n_feat].set(x.astype(jnp.bfloat16))

    # MXU-native row tile: 256 on v6e/v7x-sized MXUs when it divides Np,
    # else 128 (always legal; optimal on v5e's 128x128 MXU).
    tm = 256 if Np % 256 == 0 else 128
    n_tiles = Np // tm
    grid = (3, n_tiles)   # layer outermost (barrier), row tiles innermost

    kernel = functools.partial(_gcn_kernel, n_real=n_nodes, tm=tm)

    in_specs = [
        pl.BlockSpec((Np, Fp), lambda l, r: (0, 0)),   # X resident
        pl.BlockSpec((tm, Np), lambda l, r: (r, 0)),   # A row tile (pipelined)
        pl.BlockSpec((Fp, Hp), lambda l, r: (0, 0)),   # W1 resident
        pl.BlockSpec((Hp, Hp), lambda l, r: (0, 0)),   # W2 resident
        pl.BlockSpec((Hp, Hp), lambda l, r: (0, 0)),   # W3 resident
        pl.BlockSpec((8, Hp),  lambda l, r: (0, 0)),   # packed biases resident
        pl.BlockSpec((Bp, tm), lambda l, r: (0, r)),   # P column tile
    ]
    out_spec = pl.BlockSpec((Bp, Hp), lambda l, r: (0, 0))   # resident accum

    scratch_shapes = [
        pltpu.VMEM((Np, Hp), jnp.bfloat16),   # h after layer 1
        pltpu.VMEM((Np, Hp), jnp.bfloat16),   # h after layer 2
    ]

    # Advisory cost estimate with REAL (unpadded) dims.
    N, F, H, B = n_nodes, n_feat, n_hidden, n_graphs
    flops = (2 * N * N * F + 2 * N * F * H            # layer 1 (aggregate-first)
             + 2 * (2 * N * N * H + 2 * N * H * H)    # layers 2, 3
             + 2 * B * N * H)                         # fused mean pooling
    bytes_accessed = (N * N + N * F + F * H + 2 * H * H + 3 * H
                      + B * N + B * H) * 4

    # Scoped-VMEM budget: resident operands + double-buffered tiles + scratch.
    vmem_needed = (
        Np * Fp * 2                                   # X
        + (Fp * Hp + 2 * Hp * Hp) * 2 + 8 * Hp * 4    # W1..W3, bias tile
        + 2 * tm * Np * 2 + 2 * Bp * tm * 2           # A / P double buffers
        + Bp * Hp * 4                                 # resident output
        + 2 * Np * Hp * 2)                            # h_a, h_b scratch
    vmem_limit = int(min(100 * 2**20, max(2 * vmem_needed, 8 * 2**20)))

    out_p = pl.pallas_call(
        kernel,
        out_shape=jax.ShapeDtypeStruct((Bp, Hp), jnp.float32),
        grid_spec=pltpu.PrefetchScalarGridSpec(
            num_scalar_prefetch=0,
            grid=grid,
            in_specs=in_specs,
            out_specs=out_spec,
            scratch_shapes=scratch_shapes),
        compiler_params=pltpu.CompilerParams(
            dimension_semantics=("arbitrary", "arbitrary"),
            vmem_limit_bytes=vmem_limit),
        cost_estimate=pl.CostEstimate(
            flops=flops, transcendentals=0, bytes_accessed=bytes_accessed),
    )(x_p, a_p, w1_p, w2_p, w3_p, b_all, p_p)

    return out_p[:n_graphs, :n_hidden]


def gcn_forward(x, graph, statics):
    return _gcn_forward_padded(
        x, graph["a"], graph["p"],
        statics["w1"], statics["w2"], statics["w3"], statics["b"],
        n_nodes=graph["n_nodes"], n_feat=statics["n_feat"],
        n_hidden=statics["n_hidden"], n_graphs=graph["n_graphs"])


# ------------------------------- JAX glue ---------------------------------- #
def build_normalized_adjacency(edge_index, num_nodes):
    """Dense A_hat = D^-1/2 (A + I) D^-1/2 (GCNConv default normalization)."""
    src, dst = edge_index[0], edge_index[1]
    adj = jnp.zeros((num_nodes, num_nodes), jnp.float32)
    adj = adj.at[dst, src].add(1.0)                     # message src -> dst
    adj = adj + jnp.eye(num_nodes, dtype=jnp.float32)   # self loops
    deg = adj.sum(axis=1)
    dinv = jnp.where(deg > 0, lax.rsqrt(deg), 0.0)
    return dinv[:, None] * adj * dinv[None, :]


def build_pool_matrix(ptr, num_nodes):
    """P[b, n] = 1/count_b for ptr[b] <= n < ptr[b+1] (segment_csr mean)."""
    node = jnp.arange(num_nodes)
    lo, hi = ptr[:-1], ptr[1:]
    mask = (node[None, :] >= lo[:, None]) & (node[None, :] < hi[:, None])
    counts = jnp.maximum(hi - lo, 1).astype(jnp.float32)
    return mask.astype(jnp.float32) / counts[:, None]


def glorot(key, fan_in, fan_out):
    lim = jnp.sqrt(6.0 / (fan_in + fan_out))
    return jax.random.uniform(key, (fan_in, fan_out), jnp.float32, -lim, lim)


def init_params(key, n_feat, n_hidden):
    k1, k2, k3 = jax.random.split(key, 3)
    return (
        (glorot(k1, n_feat, n_hidden),   jnp.zeros((1, n_hidden), jnp.float32)),
        (glorot(k2, n_hidden, n_hidden), jnp.zeros((1, n_hidden), jnp.float32)),
        (glorot(k3, n_hidden, n_hidden), jnp.zeros((1, n_hidden), jnp.float32)),
    )


def reference_forward_f32(a_hat, x, params, pool):
    h = x
    for w, b in params:
        h = jnp.maximum(a_hat @ (h @ w) + b, 0.0)
    return pool @ h


def reference_forward_bf16(a_hat, x, params, pool):
    """Emulates the kernel's numerics (bf16 operands, f32 acc, (A@H)@W order)."""
    bf = lambda t: t.astype(jnp.bfloat16).astype(jnp.float32)
    a = bf(a_hat)
    h = bf(x)
    for w, b in params:
        agg = a @ h
        t = bf(agg) @ bf(w)
        h = bf(jnp.maximum(t + b, 0.0))
    return bf(pool) @ h


# --------------------------------- main ------------------------------------ #
if __name__ == "__main__":
    key = jax.random.PRNGKey(0)
    N_NODES, N_FEAT, N_HIDDEN, N_GRAPHS = 24, 16, 32, 4

    k_x, k_e, k_p = jax.random.split(key, 3)

    # node features
    x = jax.random.normal(k_x, (N_NODES, N_FEAT), jnp.float32)

    # random undirected edges (symmetric edge_index, COO (2, E))
    n_half = 40
    src = jax.random.randint(k_e, (n_half,), 0, N_NODES)
    dst = jax.random.randint(jax.random.fold_in(k_e, 1), (n_half,), 0, N_NODES)
    edge_index = jnp.stack(
        [jnp.concatenate([src, dst]), jnp.concatenate([dst, src])], axis=0)

    # CSR pointer for `batch` (segment_csr): 4 graphs of 6 nodes each
    ptr = jnp.array([0, 6, 12, 18, 24], dtype=jnp.int32)

    params = init_params(k_p, N_FEAT, N_HIDDEN)
    a_hat = build_normalized_adjacency(edge_index, N_NODES)
    pool = build_pool_matrix(ptr, N_NODES)

    # One-time preparation (hoisted out of the per-forward path).
    statics = prepare_params(params)       # once at model init
    graph = prepare_graph(a_hat, pool)     # once per graph batch (cacheable)

    out = gcn_forward(x, graph, statics)
    out = jax.block_until_ready(out)
    assert out.shape == (N_GRAPHS, N_HIDDEN)

    # Tight check against a reference that emulates the kernel's bf16/f32 mix.
    ref_bf16 = reference_forward_bf16(a_hat, x, params, pool)
    assert jnp.allclose(out, ref_bf16, atol=5e-3, rtol=5e-3), "bf16-emulated ref mismatch"

    # Looser check against the full-f32 reference (bf16 quantization error).
    ref_f32 = reference_forward_f32(a_hat, x, params, pool)
    assert jnp.allclose(out, ref_f32, atol=5e-2, rtol=5e-2), "f32 ref mismatch"

    print("KERNEL_OK")
</pallas_src>

<mosaic_0001>
module attributes {stable_mosaic.version = 11 : i64} {
  func.func @_gcn_kernel(%arg0: i32, %arg1: i32, %arg2: memref<128x128xbf16, #tpu.memory_space<vmem>>, %arg3: memref<128x128xbf16, #tpu.memory_space<vmem>>, %arg4: memref<128x128xbf16, #tpu.memory_space<vmem>>, %arg5: memref<128x128xbf16, #tpu.memory_space<vmem>>, %arg6: memref<128x128xbf16, #tpu.memory_space<vmem>>, %arg7: memref<8x128xf32, #tpu.memory_space<vmem>>, %arg8: memref<16x128xbf16, #tpu.memory_space<vmem>>, %arg9: memref<16x128xf32, #tpu.memory_space<vmem>>, %arg10: memref<128x128xbf16, #tpu.memory_space<vmem>>, %arg11: memref<128x128xbf16, #tpu.memory_space<vmem>>) attributes {dimension_semantics = [#tpu.dimension_semantics<arbitrary>, #tpu.dimension_semantics<arbitrary>], iteration_bounds = array<i64: 3, 1>, scalar_prefetch = 0 : i64, scratch_operands = 2 : i64, tpu.core_type = #tpu.core_type<tc>, window_params = [{pipeline_mode = #tpu.pipeline_mode<synchronous>, transform_indices = @transform_0, window_bounds = array<i64: 128, 128>}, {transform_indices = @transform_1, window_bounds = array<i64: 128, 128>}, {pipeline_mode = #tpu.pipeline_mode<synchronous>, transform_indices = @transform_2, window_bounds = array<i64: 128, 128>}, {pipeline_mode = #tpu.pipeline_mode<synchronous>, transform_indices = @transform_3, window_bounds = array<i64: 128, 128>}, {pipeline_mode = #tpu.pipeline_mode<synchronous>, transform_indices = @transform_4, window_bounds = array<i64: 128, 128>}, {pipeline_mode = #tpu.pipeline_mode<synchronous>, transform_indices = @transform_5, window_bounds = array<i64: 8, 128>}, {transform_indices = @transform_6, window_bounds = array<i64: 16, 128>}, {pipeline_mode = #tpu.pipeline_mode<synchronous>, transform_indices = @transform_7, window_bounds = array<i64: 16, 128>}]} {
    %c0_i32 = arith.constant 0 : i32
    %0 = arith.cmpi eq, %arg0, %c0_i32 : i32
    %c0_i32_0 = arith.constant 0 : i32
    %1 = arith.cmpi eq, %arg1, %c0_i32_0 : i32
    %2 = arith.andi %0, %1 : i1
    %3 = arith.extui %2 : i1 to i32
    %c0_i32_1 = arith.constant 0 : i32
    %4 = arith.cmpi ne, %3, %c0_i32_1 : i32
    scf.if %4 {
      %cst = arith.constant 0.000000e+00 : f32
      %22 = vector.broadcast %cst : f32 to vector<16x128xf32>
      %c0_7 = arith.constant 0 : index
      %c0_8 = arith.constant 0 : index
      %23 = vector.load %arg9[%c0_7, %c0_8] : memref<16x128xf32, #tpu.memory_space<vmem>>, vector<16x128xf32>
      tpu.vector_store %arg9[%c0_7, %c0_8], %22 {strides = array<i32>} : memref<16x128xf32, #tpu.memory_space<vmem>>, vector<16x128xf32>,
    } else {
    }
    %c128_i32 = arith.constant 128 : i32
    %5 = arith.muli %arg1, %c128_i32 : i32
    %6 = tpu.assume_multiple %5, 128 : i32
    %7 = tpu.iota {dimensions = array<i32: 0>} : vector<128x1xi32>
    %8 = vector.broadcast %6 : i32 to vector<128x1xi32>
    %9 = arith.addi %7, %8 : vector<128x1xi32>
    %c24_i32 = arith.constant 24 : i32
    %10 = vector.broadcast %c24_i32 : i32 to vector<128x1xi32>
    %11 = arith.cmpi slt, %9, %10 : vector<128x1xi32>
    %c0 = arith.constant 0 : index
    %c0_2 = arith.constant 0 : index
    %12 = vector.load %arg3[%c0, %c0_2] : memref<128x128xbf16, #tpu.memory_space<vmem>>, vector<128x128xbf16>
    %c0_i32_3 = arith.constant 0 : i32
    %13 = arith.cmpi eq, %arg0, %c0_i32_3 : i32
    %14 = arith.extui %13 : i1 to i32
    %c0_i32_4 = arith.constant 0 : i32
    %15 = arith.cmpi ne, %14, %c0_i32_4 : i32
    scf.if %15 {
      %c0_7 = arith.constant 0 : index
      %c0_8 = arith.constant 0 : index
      %22 = vector.load %arg2[%c0_7, %c0_8] : memref<128x128xbf16, #tpu.memory_space<vmem>>, vector<128x128xbf16>
      %cst = arith.constant dense<0.000000e+00> : vector<128x128xf32>
      %23 = tpu.matmul %12, %22, %cst {dimension_numbers = #tpu.dot_dimension_numbers<[1], [0], [0], [1], [0, 0, 1, 1], [], []>} : vector<128x128xbf16>, vector<128x128xbf16>, vector<128x128xf32> -> vector<128x128xf32>
      %24 = arith.truncf %23 : vector<128x128xf32> to vector<128x128xbf16>
      %c0_9 = arith.constant 0 : index
      %c0_10 = arith.constant 0 : index
      %25 = vector.load %arg4[%c0_9, %c0_10] : memref<128x128xbf16, #tpu.memory_space<vmem>>, vector<128x128xbf16>
      %cst_11 = arith.constant dense<0.000000e+00> : vector<128x128xf32>
      %26 = tpu.matmul %24, %25, %cst_11 {dimension_numbers = #tpu.dot_dimension_numbers<[1], [0], [0], [1], [0, 0, 1, 1], [], []>} : vector<128x128xbf16>, vector<128x128xbf16>, vector<128x128xf32> -> vector<128x128xf32>
      %c0_12 = arith.constant 0 : index
      %c0_13 = arith.constant 0 : index
      %27 = vector.load %arg7[%c0_12, %c0_13] : memref<8x128xf32, #tpu.memory_space<vmem>>, vector<1x128xf32>
      %28 = vector.broadcast %27 : vector<1x128xf32> to vector<128x128xf32>
      %29 = arith.addf %26, %28 : vector<128x128xf32>
      %cst_14 = arith.constant 0.000000e+00 : f32
      %30 = vector.broadcast %cst_14 : f32 to vector<128x128xf32>
      %31 = arith.maximumf %29, %30 : vector<128x128xf32>
      %cst_15 = arith.constant 0.000000e+00 : f32
      %32 = vector.shape_cast %11 : vector<128x1xi1> to vector<128x1xi1>
      %33 = vector.broadcast %32 : vector<128x1xi1> to vector<128x128xi1>
      %34 = vector.broadcast %cst_15 : f32 to vector<128x128xf32>
      %35 = arith.select %33, %31, %34 : vector<128x128xi1>, vector<128x128xf32>
      %36 = arith.truncf %35 : vector<128x128xf32> to vector<128x128xbf16>
      %37 = arith.index_cast %6 : i32 to index
      %c0_16 = arith.constant 0 : index
      %38 = vector.load %arg10[%37, %c0_16] : memref<128x128xbf16, #tpu.memory_space<vmem>>, vector<128x128xbf16>
      tpu.vector_store %arg10[%37, %c0_16], %36 {strides = array<i32>} : memref<128x128xbf16, #tpu.memory_space<vmem>>, vector<128x128xbf16>,
    } else {
    }
    %c1_i32 = arith.constant 1 : i32
    %16 = arith.cmpi eq, %arg0, %c1_i32 : i32
    %17 = arith.extui %16 : i1 to i32
    %c0_i32_5 = arith.constant 0 : i32
    %18 = arith.cmpi ne, %17, %c0_i32_5 : i32
    scf.if %18 {
      %c0_7 = arith.constant 0 : index
      %c0_8 = arith.constant 0 : index
      %22 = vector.load %arg10[%c0_7, %c0_8] : memref<128x128xbf16, #tpu.memory_space<vmem>>, vector<128x128xbf16>
      %cst = arith.constant dense<0.000000e+00> : vector<128x128xf32>
      %23 = tpu.matmul %12, %22, %cst {dimension_numbers = #tpu.dot_dimension_numbers<[1], [0], [0], [1], [0, 0, 1, 1], [], []>} : vector<128x128xbf16>, vector<128x128xbf16>, vector<128x128xf32> -> vector<128x128xf32>
      %24 = arith.truncf %23 : vector<128x128xf32> to vector<128x128xbf16>
      %c0_9 = arith.constant 0 : index
      %c0_10 = arith.constant 0 : index
      %25 = vector.load %arg5[%c0_9, %c0_10] : memref<128x128xbf16, #tpu.memory_space<vmem>>, vector<128x128xbf16>
      %cst_11 = arith.constant dense<0.000000e+00> : vector<128x128xf32>
      %26 = tpu.matmul %24, %25, %cst_11 {dimension_numbers = #tpu.dot_dimension_numbers<[1], [0], [0], [1], [0, 0, 1, 1], [], []>} : vector<128x128xbf16>, vector<128x128xbf16>, vector<128x128xf32> -> vector<128x128xf32>
      %c1 = arith.constant 1 : index
      %c0_12 = arith.constant 0 : index
      %27 = vector.load %arg7[%c1, %c0_12] : memref<8x128xf32, #tpu.memory_space<vmem>>, vector<1x128xf32>
      %28 = vector.broadcast %27 : vector<1x128xf32> to vector<128x128xf32>
      %29 = arith.addf %26, %28 : vector<128x128xf32>
      %cst_13 = arith.constant 0.000000e+00 : f32
      %30 = vector.broadcast %cst_13 : f32 to vector<128x128xf32>
      %31 = arith.maximumf %29, %30 : vector<128x128xf32>
      %cst_14 = arith.constant 0.000000e+00 : f32
      %32 = vector.shape_cast %11 : vector<128x1xi1> to vector<128x1xi1>
      %33 = vector.broadcast %32 : vector<128x1xi1> to vector<128x128xi1>
      %34 = vector.broadcast %cst_14 : f32 to vector<128x128xf32>
      %35 = arith.select %33, %31, %34 : vector<128x128xi1>, vector<128x128xf32>
      %36 = arith.truncf %35 : vector<128x128xf32> to vector<128x128xbf16>
      %37 = arith.index_cast %6 : i32 to index
      %c0_15 = arith.constant 0 : index
      %38 = vector.load %arg11[%37, %c0_15] : memref<128x128xbf16, #tpu.memory_space<vmem>>, vector<128x128xbf16>
      tpu.vector_store %arg11[%37, %c0_15], %36 {strides = array<i32>} : memref<128x128xbf16, #tpu.memory_space<vmem>>, vector<128x128xbf16>,
    } else {
    }
    %c2_i32 = arith.constant 2 : i32
    %19 = arith.cmpi eq, %arg0, %c2_i32 : i32
    %20 = arith.extui %19 : i1 to i32
    %c0_i32_6 = arith.constant 0 : i32
    %21 = arith.cmpi ne, %20, %c0_i32_6 : i32
    scf.if %21 {
      %c0_7 = arith.constant 0 : index
      %c0_8 = arith.constant 0 : index
      %22 = vector.load %arg11[%c0_7, %c0_8] : memref<128x128xbf16, #tpu.memory_space<vmem>>, vector<128x128xbf16>
      %cst = arith.constant dense<0.000000e+00> : vector<128x128xf32>
      %23 = tpu.matmul %12, %22, %cst {dimension_numbers = #tpu.dot_dimension_numbers<[1], [0], [0], [1], [0, 0, 1, 1], [], []>} : vector<128x128xbf16>, vector<128x128xbf16>, vector<128x128xf32> -> vector<128x128xf32>
      %24 = arith.truncf %23 : vector<128x128xf32> to vector<128x128xbf16>
      %c0_9 = arith.constant 0 : index
      %c0_10 = arith.constant 0 : index
      %25 = vector.load %arg6[%c0_9, %c0_10] : memref<128x128xbf16, #tpu.memory_space<vmem>>, vector<128x128xbf16>
      %cst_11 = arith.constant dense<0.000000e+00> : vector<128x128xf32>
      %26 = tpu.matmul %24, %25, %cst_11 {dimension_numbers = #tpu.dot_dimension_numbers<[1], [0], [0], [1], [0, 0, 1, 1], [], []>} : vector<128x128xbf16>, vector<128x128xbf16>, vector<128x128xf32> -> vector<128x128xf32>
      %c2 = arith.constant 2 : index
      %c0_12 = arith.constant 0 : index
      %27 = vector.load %arg7[%c2, %c0_12] : memref<8x128xf32, #tpu.memory_space<vmem>>, vector<1x128xf32>
      %28 = vector.broadcast %27 : vector<1x128xf32> to vector<128x128xf32>
      %29 = arith.addf %26, %28 : vector<128x128xf32>
      %cst_13 = arith.constant 0.000000e+00 : f32
      %30 = vector.broadcast %cst_13 : f32 to vector<128x128xf32>
      %31 = arith.maximumf %29, %30 : vector<128x128xf32>
      %cst_14 = arith.constant 0.000000e+00 : f32
      %32 = vector.shape_cast %11 : vector<128x1xi1> to vector<128x1xi1>
      %33 = vector.broadcast %32 : vector<128x1xi1> to vector<128x128xi1>
      %34 = vector.broadcast %cst_14 : f32 to vector<128x128xf32>
      %35 = arith.select %33, %31, %34 : vector<128x128xi1>, vector<128x128xf32>
      %36 = arith.truncf %35 : vector<128x128xf32> to vector<128x128xbf16>
      %c0_15 = arith.constant 0 : index
      %c0_16 = arith.constant 0 : index
      %37 = vector.load %arg9[%c0_15, %c0_16] : memref<16x128xf32, #tpu.memory_space<vmem>>, vector<16x128xf32>
      %c0_17 = arith.constant 0 : index
      %c0_18 = arith.constant 0 : index
      %38 = vector.load %arg8[%c0_17, %c0_18] : memref<16x128xbf16, #tpu.memory_space<vmem>>, vector<16x128xbf16>
      %cst_19 = arith.constant dense<0.000000e+00> : vector<16x128xf32>
      %39 = tpu.matmul %38, %36, %cst_19 {dimension_numbers = #tpu.dot_dimension_numbers<[1], [0], [0], [1], [0, 0, 1, 1], [], []>} : vector<16x128xbf16>, vector<128x128xbf16>, vector<16x128xf32> -> vector<16x128xf32>
      %40 = arith.addf %37, %39 : vector<16x128xf32>
      %c0_20 = arith.constant 0 : index
      %c0_21 = arith.constant 0 : index
      %41 = vector.load %arg9[%c0_20, %c0_21] : memref<16x128xf32, #tpu.memory_space<vmem>>, vector<16x128xf32>
      tpu.vector_store %arg9[%c0_20, %c0_21], %40 {strides = array<i32>} : memref<16x128xf32, #tpu.memory_space<vmem>>, vector<16x128xf32>,
    } else {
    }
    return
  }
  func.func @transform_0(%arg0: i32, %arg1: i32) -> (i32, i32) {
    %c0_i32 = arith.constant 0 : i32
    %c0_i32_0 = arith.constant 0 : i32
    %c0_i32_1 = arith.constant 0 : i32
    return %c0_i32, %c0_i32_0 : i32, i32
  }
  func.func @transform_1(%arg0: i32, %arg1: i32) -> (i32, i32) {
    %c0_i32 = arith.constant 0 : i32
    %c0_i32_0 = arith.constant 0 : i32
    return %arg1, %c0_i32 : i32, i32
  }
  func.func @transform_2(%arg0: i32, %arg1: i32) -> (i32, i32) {
    %c0_i32 = arith.constant 0 : i32
    %c0_i32_0 = arith.constant 0 : i32
    %c0_i32_1 = arith.constant 0 : i32
    return %c0_i32, %c0_i32_0 : i32, i32
  }
  func.func @transform_3(%arg0: i32, %arg1: i32) -> (i32, i32) {
    %c0_i32 = arith.constant 0 : i32
    %c0_i32_0 = arith.constant 0 : i32
    %c0_i32_1 = arith.constant 0 : i32
    return %c0_i32, %c0_i32_0 : i32, i32
  }
  func.func @transform_4(%arg0: i32, %arg1: i32) -> (i32, i32) {
    %c0_i32 = arith.constant 0 : i32
    %c0_i32_0 = arith.constant 0 : i32
    %c0_i32_1 = arith.constant 0 : i32
    return %c0_i32, %c0_i32_0 : i32, i32
  }
  func.func @transform_5(%arg0: i32, %arg1: i32) -> (i32, i32) {
    %c0_i32 = arith.constant 0 : i32
    %c0_i32_0 = arith.constant 0 : i32
    %c0_i32_1 = arith.constant 0 : i32
    return %c0_i32, %c0_i32_0 : i32, i32
  }
  func.func @transform_6(%arg0: i32, %arg1: i32) -> (i32, i32) {
    %c0_i32 = arith.constant 0 : i32
    %c0_i32_0 = arith.constant 0 : i32
    return %c0_i32, %arg1 : i32, i32
  }
  func.func @transform_7(%arg0: i32, %arg1: i32) -> (i32, i32) {
    %c0_i32 = arith.constant 0 : i32
    %c0_i32_0 = arith.constant 0 : i32
    %c0_i32_1 = arith.constant 0 : i32
    return %c0_i32, %c0_i32_0 : i32, i32
  }
}

</mosaic_0001>

<bundles_post_ra>
// kernel: _gcn_forward_padded.1
= control target key start
LH: loop header
LB: loop body
LE: loop exit
PB: predicated region body
PF: predicated region fallthrough
CT: control target
= control target key end

     0   :  { %12 = vsyncpa [#allocation5], 0  ;;  %s2824_s0 = inlined_call_operand.vmem [shape: bf16[128,128], index: 0, kind: input, shape index: {}]   ;;  %s2825_s1 = inlined_call_operand.vmem [shape: bf16[128,128], index: 1, kind: input, shape index: {}]   ;;  %s2826_s2 = inlined_call_operand.hbm [shape: bf16[128,128], index: 2, kind: input, shape index: {}]   ;;  %s2827_s3 = inlined_call_operand.hbm [shape: bf16[128,128], index: 3, kind: input, shape index: {}]   ;;  %s2828_s4 = inlined_call_operand.hbm [shape: bf16[128,128], index: 4, kind: input, shape index: {}]   ;;  %s2829_s5 = inlined_call_operand.vmem [shape: f32[8,128], index: 5, kind: input, shape index: {}]   ;;  %s2830_s6 = inlined_call_operand.vmem [shape: bf16[16,128], index: 6, kind: input, shape index: {}]   ;;  %s2831_s7 = inlined_call_operand.vmem [shape: f32[16,128], index: 7, kind: output, shape index: {}]  }
   0x1   :  { %13 = vsyncpa [#allocation7], 0  ;;  %s2431_s24 = smov 0   ;;  %s2433_s25 = smov 0  }
   0x2   :  { %s2435_s26 = smov 0  }
   0x3 LB: > { %s1673_s27 = sadd.s32 4294967295, %s2381_s26   ;;  %p1674_p0 = scmp.ge.s32.totalorder %s2381_s26, 1  ;;  %s2381_s26 = sphi %s2435_s26, %s19_s26   ;;  %s2377_s25 = sphi %s2433_s25, %s2836_s25   ;;  %s2373_s24 = sphi %s2431_s24, %s2835_s24  }
   0x4   : > { %p214_p1 = scmp.lt.s32.totalorder %s2381_s26, 4  ;;  %p2449_p2 = scmp.eq.s32.totalorder %s1673_s27, 0 }
   0x5   : > { %s251_s8 = sshll.u32 %s2827_s3, 4  ;;  %s2383_s10 = smov [#allocation6]   ;;  %s252_s8 = int_to_ptr.hbm [resolvable:$true] %s251_s8 }
   0x6   : > { %p2456_p3 = pnand %p1674_p0, %p214_p1  ;;  %s253_s11 = sshll.u32 %s2383_s10, 4  ;;  %s254_s11 = int_to_ptr.vmem [resolvable:$true] %s253_s11 }
   0x7   : > { %s31_s13 = sadd.s32 1, %s2377_s25  ;;  %s2384_s14 = smov 64  }
   0x8   : > { %p2210_p4 = pneg %p2456_p3  ;;  %p33_p6 = scmp.ge.s32.totalorder %s31_s13, 3 }
   0x9   : > { %s2385_s15 = smov 4   ;;  %s237_s18 = sshll.u32 %s2826_s2, 4  ;;  %s238_s18 = int_to_ptr.hbm [resolvable:$true] %s237_s18 }
   0xa   : > { %p2464_p5 = pnand %p2449_p2, %p2210_p4  ;;  %s2838_s13 = smov (%p33_p6, %s31_s13), 0 }
   0xb   : > { %s2386_s19 = smov [#allocation4]   ;;  %s265_s23 = sshll.u32 %s2828_s4, 4  ;;  %s266_s23 = int_to_ptr.hbm [resolvable:$true] %s265_s23 }
   0xc   : > { %2216 = dma.hbm_to_vmem [thread:$0]  (!%p2464_p5), %s252_s8, 1024, %s254_s11, [#allocation7], %s2384_s14, %s2384_s14, %s2385_s15  }
   0xd   : > { %s239_s20 = sshll.u32 %s2386_s19, 4  ;;  %s2387_s27 = smov [#allocation8]   ;;  %s240_s20 = int_to_ptr.vmem [resolvable:$true] %s239_s20 }
   0xe   : > { %2213 = dma.hbm_to_vmem [thread:$0]  (!%p2464_p5), %s238_s18, 1024, %s240_s20, [#allocation5], %s2384_s14, %s2384_s14, %s2385_s15  }
   0xf   : > { %s267_s29 = sshll.u32 %s2387_s27, 4  ;;  %293 = sbr.rel (%p2456_p3) target bundleno = 1256 (0x4e8), region = 48  ;;  %s268_s29 = int_to_ptr.vmem [resolvable:$true] %s267_s29 }
  0x10   : > { %2219 = dma.hbm_to_vmem [thread:$0]  (!%p2464_p5), %s266_s23, 1024, %s268_s29, [#allocation7], %s2384_s14, %s2384_s14, %s2385_s15  }
  0x14   : > { %2364 = dma.done.wait (%p2449_p2), [#allocation5], 1024  }
  0x15   : > { %2366 = vsyncadd (%p2449_p2), [#allocation5], 4294966272 }
  0x16   : > { %2368 = dma.done.wait (%p2449_p2), [#allocation7], 2048  }
  0x17   : > { %2370 = vsyncadd (%p2449_p2), [#allocation7], 4294965248  ;;  %p345_p7 = scmp.eq.s32.totalorder %s2373_s24, 0 }
  0x18   : > { %v2388_v0 = vmov (%p345_p7), 0.0  }
  0x19   : > { %350 = sbr.rel (!%p345_p7) target bundleno = 30 (0x1e), region = 64  ;;  %351 = vst [vmem:[%s2831_s7] sm:$0xff] (%p345_p7), %v2388_v0 }
  0x1a   : > { %352 = vst [vmem:[%s2831_s7 + $0x8] sm:$0xff] (%p345_p7), %v2388_v0 }
  0x1e PF: > { %v2503_v1 = vld [vmem:[%s2825_s1] sm:$0xf]  ;;  %v2518_v4 = vld [vmem:[%s2825_s1] sm:$0xf0]  ;;  %v2533_v7 = vld [vmem:[%s2825_s1 + $0x8] sm:$0xf] }
  0x1f   : > { %v2508_v2 = vld [vmem:[%s2825_s1] sm:$0xf]  ;;  %v2523_v5 = vld [vmem:[%s2825_s1] sm:$0xf0]  ;;  %v2538_v8 = vld [vmem:[%s2825_s1 + $0x8] sm:$0xf] }
  0x20   : > { %v2513_v3 = vld [vmem:[%s2825_s1] sm:$0xf]  ;;  %v2528_v6 = vld [vmem:[%s2825_s1] sm:$0xf0]  ;;  %v2543_v9 = vld [vmem:[%s2825_s1 + $0x8] sm:$0xf] }
  0x21   : > { %v2548_v10 = vld [vmem:[%s2825_s1 + $0x8] sm:$0xf0]  ;;  %v2563_v13 = vld [vmem:[%s2825_s1 + $0x10] sm:$0xf]  ;;  %v2578_v16 = vld [vmem:[%s2825_s1 + $0x10] sm:$0xf0] }
  0x22   : > { %v2553_v11 = vld [vmem:[%s2825_s1 + $0x8] sm:$0xf0]  ;;  %v2568_v14 = vld [vmem:[%s2825_s1 + $0x10] sm:$0xf]  ;;  %v2583_v17 = vld [vmem:[%s2825_s1 + $0x10] sm:$0xf0] }
  0x23   : > { %v2558_v12 = vld [vmem:[%s2825_s1 + $0x8] sm:$0xf0]  ;;  %v2573_v15 = vld [vmem:[%s2825_s1 + $0x10] sm:$0xf]  ;;  %v2588_v18 = vld [vmem:[%s2825_s1 + $0x10] sm:$0xf0] }
  0x24   : > { %v2593_v19 = vld [vmem:[%s2825_s1 + $0x18] sm:$0xf]  ;;  %v2608_v22 = vld [vmem:[%s2825_s1 + $0x18] sm:$0xf0]  ;;  %v2623_v25 = vld [vmem:[%s2825_s1 + $0x20] sm:$0xf] }
  0x25   : > { %v2598_v20 = vld [vmem:[%s2825_s1 + $0x18] sm:$0xf]  ;;  %v2613_v23 = vld [vmem:[%s2825_s1 + $0x18] sm:$0xf0]  ;;  %v2628_v26 = vld [vmem:[%s2825_s1 + $0x20] sm:$0xf] }
  0x26   : > { %v2603_v21 = vld [vmem:[%s2825_s1 + $0x18] sm:$0xf]  ;;  %v2618_v24 = vld [vmem:[%s2825_s1 + $0x18] sm:$0xf0]  ;;  %v1704_v27 = vld [vmem:[%s2825_s1 + $0x20] sm:$0xf] }
  0x27   : > { %v2636_v28 = vld [vmem:[%s2825_s1 + $0x20] sm:$0xf0]  ;;  %v2649_v31 = vld [vmem:[%s2825_s1 + $0x28] sm:$0xf]  ;;  %v2662_v34 = vld [vmem:[%s2825_s1 + $0x28] sm:$0xf0] }
  0x28   : > { %v2641_v29 = vld [vmem:[%s2825_s1 + $0x20] sm:$0xf0]  ;;  %v2654_v32 = vld [vmem:[%s2825_s1 + $0x28] sm:$0xf]  ;;  %v2667_v35 = vld [vmem:[%s2825_s1 + $0x28] sm:$0xf0] }
  0x29   : > { %v1997_v30 = vld [vmem:[%s2825_s1 + $0x20] sm:$0xf0]  ;;  %v1708_v33 = vld [vmem:[%s2825_s1 + $0x28] sm:$0xf]  ;;  %v2000_v36 = vld [vmem:[%s2825_s1 + $0x28] sm:$0xf0] }
  0x2a   : > { %v2675_v37 = vld [vmem:[%s2825_s1 + $0x30] sm:$0xf]  ;;  %v2688_v40 = vld [vmem:[%s2825_s1 + $0x30] sm:$0xf0]  ;;  %v2701_v43 = vld [vmem:[%s2825_s1 + $0x38] sm:$0xf] }
  0x2b   : > { %v2680_v38 = vld [vmem:[%s2825_s1 + $0x30] sm:$0xf]  ;;  %v2693_v41 = vld [vmem:[%s2825_s1 + $0x30] sm:$0xf0]  ;;  %v2706_v44 = vld [vmem:[%s2825_s1 + $0x38] sm:$0xf] }
  0x2c   : > { %v1712_v39 = vld [vmem:[%s2825_s1 + $0x30] sm:$0xf]  ;;  %v2003_v42 = vld [vmem:[%s2825_s1 + $0x30] sm:$0xf0]  ;;  %v1716_v45 = vld [vmem:[%s2825_s1 + $0x38] sm:$0xf] }
  0x2d   : > { %v2714_v46 = vld [vmem:[%s2825_s1 + $0x38] sm:$0xf0]  ;;  %p1685_p8 = scmp.ne.s32.totalorder %s2373_s24, 0 }
  0x2e   : > { %v2719_v47 = vld [vmem:[%s2825_s1 + $0x38] sm:$0xf0] }
  0x2f   : > { %v2006_v48 = vld [vmem:[%s2825_s1 + $0x38] sm:$0xf0]  ;;  %422 = sbr.rel (%p1685_p8) target bundleno = 414 (0x19e), region = 68 }
  0x34   : > { %v2014_v49 = vld [vmem:[%s2824_s0 + $0x38] sm:$0xff]  ;;  %v2013_v50 = vld [vmem:[%s2824_s0 + $0x30] sm:$0xff]  ;;  %v2012_v51 = vld [vmem:[%s2824_s0 + $0x28] sm:$0xff]  ;;  %v1689_v57 = vor.u32 %v2528_v6, %v2513_v3  ;;  %v1705_v58 = vor.u32 %v1997_v30, %v1704_v27  ;;  %v1693_v59 = vor.u32 %v2558_v12, %v2543_v9  ;;  %v1709_v60 = vor.u32 %v2000_v36, %v1708_v33 }
  0x35   : > { %535 = vmatpush.bf16.msra.mxu0 %v2014_v49  ;;  %2150 = vmatpush.bf16.msra.mxu2 %v2014_v49  ;;  %v2011_v52 = vld [vmem:[%s2824_s0 + $0x20] sm:$0xff]  ;;  %v2010_v53 = vld [vmem:[%s2824_s0 + $0x18] sm:$0xff]  ;;  %v2009_v54 = vld [vmem:[%s2824_s0 + $0x10] sm:$0xff]  ;;  %v1697_v3 = vor.u32 %v2588_v18, %v2573_v15  ;;  %v1713_v6 = vor.u32 %v2003_v42, %v1712_v39  ;;  %v1701_v9 = vor.u32 %v2618_v24, %v2603_v21 }
  0x36   : > { %v2008_v55 = vld [vmem:[%s2824_s0 + $0x8] sm:$0xff]  ;;  %v2007_v56 = vld [vmem:[%s2824_s0] sm:$0xff]  ;;  %v2022_v61 = vld [vmem:[#allocation4 + $0x38] sm:$0xff]  ;;  %v1717_v12 = vor.u32 %v2006_v48, %v1716_v45 }
  0x37   : > { %658 = vmatpush.bf16.msra.mxu1 %v2022_v61  ;;  %v2021_v62 = vld [vmem:[#allocation4 + $0x30] sm:$0xff]  ;;  %2158 = vmatpush.bf16.msra.mxu3 %v2022_v61  ;;  %v2020_v63 = vld [vmem:[#allocation4 + $0x28] sm:$0xff]  ;;  %v2019_v0 = vld [vmem:[#allocation4 + $0x20] sm:$0xff] }
  0x38   : > { %v2018_v27 = vld [vmem:[#allocation4 + $0x18] sm:$0xff]  ;;  %v2017_v30 = vld [vmem:[#allocation4 + $0x10] sm:$0xff]  ;;  %v2016_v33 = vld [vmem:[#allocation4 + $0x8] sm:$0xff] }
  0x39   : > { %536 = vmatpush.bf16.msra.mxu0 %v2013_v50  ;;  %2151 = vmatpush.bf16.msra.mxu2 %v2013_v50  ;;  %v2015_v15 = vld [vmem:[#allocation4] sm:$0xff] }
  0x3b   : > { %659 = vmatpush.bf16.msra.mxu1 %v2021_v62  ;;  %2159 = vmatpush.bf16.msra.mxu3 %v2021_v62 }
  0x3d   : > { %537 = vmatpush.bf16.msra.mxu0 %v2012_v51  ;;  %2152 = vmatpush.bf16.msra.mxu2 %v2012_v51 }
  0x3f   : > { %660 = vmatpush.bf16.msra.mxu1 %v2020_v63  ;;  %2160 = vmatpush.bf16.msra.mxu3 %v2020_v63 }
  0x41   : > { %538 = vmatpush.bf16.msra.mxu0 %v2011_v52  ;;  %2153 = vmatpush.bf16.msra.mxu2 %v2011_v52 }
  0x43   : > { %661 = vmatpush.bf16.msra.mxu1 %v2019_v0  ;;  %2161 = vmatpush.bf16.msra.mxu3 %v2019_v0 }
  0x45   : > { %539 = vmatpush.bf16.msra.mxu0 %v2010_v53  ;;  %2154 = vmatpush.bf16.msra.mxu2 %v2010_v53 }
  0x47   : > { %662 = vmatpush.bf16.msra.mxu1 %v2018_v27  ;;  %2162 = vmatpush.bf16.msra.mxu3 %v2018_v27 }
  0x49   : > { %540 = vmatpush.bf16.msra.mxu0 %v2009_v54  ;;  %2155 = vmatpush.bf16.msra.mxu2 %v2009_v54 }
  0x4b   : > { %663 = vmatpush.bf16.msra.mxu1 %v2017_v30  ;;  %2163 = vmatpush.bf16.msra.mxu3 %v2017_v30 }
  0x4d   : > { %541 = vmatpush.bf16.msra.mxu0 %v2008_v55  ;;  %2156 = vmatpush.bf16.msra.mxu2 %v2008_v55 }
  0x4f   : > { %664 = vmatpush.bf16.msra.mxu1 %v2016_v33  ;;  %2164 = vmatpush.bf16.msra.mxu3 %v2016_v33 }
  0x51   : > { %542 = vmatpush.bf16.msra.mxu0 %v2007_v56  ;;  %2157 = vmatpush.bf16.msra.mxu2 %v2007_v56 }
  0x53   : > { %665 = vmatpush.bf16.msra.mxu1 %v2015_v15  ;;  %2165 = vmatpush.bf16.msra.mxu3 %v2015_v15 }
  0x54   : > { %543 = vmatmul.bf16.vlgmr.msra.gmra.mxu0 %v1689_v57  ;;  %563 = vmatmul.bf16.vlgmr.msra.gmra.mxu2 %v1705_v58 }
  0x64   : > { %548 = vmatmul.bf16.gmra.mxu0 %v1693_v59  ;;  %568 = vmatmul.bf16.gmra.mxu2 %v1709_v60 }
  0x74   : > { %553 = vmatmul.bf16.gmra.mxu0 %v1697_v3  ;;  %573 = vmatmul.bf16.gmra.mxu2 %v1713_v6  ;;  %v2389_v3 = vmov 0.0|0.0  }
  0x75   : > { %v2063_v6 = vunpack.c.l.bf16 %v2389_v3 }
  0x77   : > { %v2069_v27 = vpack.c.bf16 %v2063_v6, %v2063_v6 }
  0x79   : > { %2137 = vst [vmem:[#allocation2 + $0x18] sm:$0xff] %v2069_v27  }
  0x7a   : > { %2138 = vst [vmem:[#allocation2 + $0x10] sm:$0xff] %v2069_v27  }
  0x7b   : > { %2139 = vst [vmem:[#allocation2 + $0x8] sm:$0xff] %v2069_v27  }
  0x7c   : > { %2140 = vst [vmem:[#allocation2 + $0x20] sm:$0xff] %v2069_v27  }
  0x7d   : > { %2141 = vst [vmem:[#allocation2 + $0x28] sm:$0xff] %v2069_v27  }
  0x7e   : > { %2142 = vst [vmem:[#allocation2 + $0x38] sm:$0xff] %v2069_v27  }
  0x84   : > { %558 = vmatmul.bf16.gmra.mxu0 %v1701_v9  ;;  %578 = vmatmul.bf16.gmra.mxu2 %v1717_v12  ;;  %v2258_v12 = vld [vmem:[%s2829_s5] ss:$0 sm:$0xff] }
  0xd1   : > { %v544_v18 = vpop.f32.mrf.mxu0 }
  0xd7   : > { %v564_v36 = vpop.f32.mrf.mxu2 }
  0xd9   : > { %v546_v39 = vpop.f32.mrf.mxu0 }
  0xda   : > { %v584_v42 = vpack.c.bf16 %v546_v39, %v544_v18 }
  0xdc   : > { %666 = vmatmul.bf16.vlgmr.msra.gmra.mxu1 %v584_v42 }
  0xdf   : > { %v566_v49 = vpop.f32.mrf.mxu2 }
  0xe0   : > { %v588_v50 = vpack.c.bf16 %v566_v49, %v564_v36 }
  0xe1   : > { %v549_v21 = vpop.f32.mrf.mxu0 }
  0xe2   : > { %686 = vmatmul.bf16.vlgmr.msra.gmra.mxu3 %v588_v50 }
  0xe7   : > { %v569_v24 = vpop.f32.mrf.mxu2 }
  0xe9   : > { %v551_v45 = vpop.f32.mrf.mxu0 }
  0xea   : > { %v585_v48 = vpack.c.bf16 %v551_v45, %v549_v21 }
  0xec   : > { %671 = vmatmul.bf16.gmra.mxu1 %v585_v48 }
  0xef   : > { %v571_v51 = vpop.f32.mrf.mxu2 }
  0xf0   : > { %v589_v52 = vpack.c.bf16 %v571_v51, %v569_v24 }
  0xf1   : > { %v554_v53 = vpop.f32.mrf.mxu0 }
  0xf2   : > { %691 = vmatmul.bf16.gmra.mxu3 %v589_v52 }
  0xf7   : > { %v574_v54 = vpop.f32.mrf.mxu2 }
  0xf9   : > { %v556_v55 = vpop.f32.mrf.mxu0 }
  0xfa   : > { %v586_v56 = vpack.c.bf16 %v556_v55, %v554_v53 }
  0xfc   : > { %676 = vmatmul.bf16.gmra.mxu1 %v586_v56 }
  0xff   : > { %v576_v57 = vpop.f32.mrf.mxu2 }
 0x100   : > { %v590_v58 = vpack.c.bf16 %v576_v57, %v574_v54 }
 0x101   : > { %v559_v59 = vpop.f32.mrf.mxu0 }
 0x102   : > { %696 = vmatmul.bf16.gmra.mxu3 %v590_v58 }
 0x107   : > { %v579_v60 = vpop.f32.mrf.mxu2 }
 0x109   : > { %v561_v61 = vpop.f32.mrf.mxu0 }
 0x10a   : > { %v587_v62 = vpack.c.bf16 %v561_v61, %v559_v59 }
 0x10c   : > { %681 = vmatmul.bf16.gmra.mxu1 %v587_v62 }
 0x10f   : > { %v581_v63 = vpop.f32.mrf.mxu2 }
 0x110   : > { %v591_v0 = vpack.c.bf16 %v581_v63, %v579_v60 }
 0x112   : > { %701 = vmatmul.bf16.gmra.mxu3 %v591_v0 }
 0x159   : > { %v667_v9 = vpop.f32.mrf.mxu1 }
 0x15a   : > { %v668_v30 = vadd.f32 %v2258_v12, %v667_v9 }
 0x15c   : > { %v707_v18 = vmax.f32 %v668_v30, 0.0 }
 0x161   : > { %v669_v33 = vpop.f32.mrf.mxu1 }
 0x162   : > { %v670_v15 = vadd.f32 %v2258_v12, %v669_v33 }
 0x164   : > { %v708_v36 = vmax.f32 %v670_v15, 0.0 }
 0x165   : > { %v687_v39 = vpop.f32.mrf.mxu3 }
 0x166   : > { %v2059_v42 = vpack.c.bf16 %v708_v36, %v707_v18 }
 0x168   : > { %2060 = vst [vmem:[#allocation2 + $0x30] sm:$0xff] %v2059_v42  }
 0x169   : > { %v672_v49 = vpop.f32.mrf.mxu1 }
 0x16a   : > { %v673_v50 = vadd.f32 %v2258_v12, %v672_v49 }
 0x16c   : > { %v709_v21 = vmax.f32 %v673_v50, 0.0 }
 0x16d   : > { %v689_v24 = vpop.f32.mrf.mxu3 }
 0x16e   : > { %v2064_v45 = vpack.c.bf16 %v2063_v6, %v709_v21 }
 0x170   : > { %2136 = vst [vmem:[#allocation2] sm:$0xff] %v2064_v45  }
 0x171   : > { %v674_v48 = vpop.f32.mrf.mxu1 }
 0x175   : > { %v692_v51 = vpop.f32.mrf.mxu3 }
 0x179   : > { %v677_v52 = vpop.f32.mrf.mxu1 }
 0x17d   : > { %v694_v53 = vpop.f32.mrf.mxu3 }
 0x181   : > { %v679_v54 = vpop.f32.mrf.mxu1 }
 0x185   : > { %v697_v55 = vpop.f32.mrf.mxu3 }
 0x189   : > { %v682_v56 = vpop.f32.mrf.mxu1 }
 0x18d   : > { %v699_v57 = vpop.f32.mrf.mxu3 }
 0x191   : > { %v684_v58 = vpop.f32.mrf.mxu1 }
 0x195   : > { %v702_v59 = vpop.f32.mrf.mxu3 }
 0x19d   : > { %v704_v60 = vpop.f32.mrf.mxu3 }
 0x19e PF: > { %p1782_p9 = scmp.ne.s32.totalorder %s2373_s24, 1 }
 0x1a0   : > { %810 = sbr.rel (%p1782_p9) target bundleno = 783 (0x30f), region = 72 }
 0x1a5   : > { %v2030_v61 = vld [vmem:[#allocation2 + $0x38] sm:$0xff]  ;;  %v2029_v62 = vld [vmem:[#allocation2 + $0x28] sm:$0xff]  ;;  %v2028_v63 = vld [vmem:[#allocation2 + $0x20] sm:$0xff]  ;;  %v1786_v12 = vor.u32 %v2523_v5, %v2508_v2  ;;  %v1802_v30 = vor.u32 %v2641_v29, %v2628_v26  ;;  %v1790_v33 = vor.u32 %v2553_v11, %v2538_v8  ;;  %v1806_v15 = vor.u32 %v2667_v35, %v2654_v32 }
 0x1a6   : > { %923 = vmatpush.bf16.msra.mxu0 %v2030_v61  ;;  %2166 = vmatpush.bf16.msra.mxu2 %v2030_v61  ;;  %v2027_v0 = vld [vmem:[#allocation2 + $0x8] sm:$0xff]  ;;  %v2026_v3 = vld [vmem:[#allocation2 + $0x10] sm:$0xff]  ;;  %v2025_v6 = vld [vmem:[#allocation2 + $0x18] sm:$0xff]  ;;  %v1794_v26 = vor.u32 %v2583_v17, %v2568_v14  ;;  %v1810_v8 = vor.u32 %v2693_v41, %v2680_v38  ;;  %v1798_v29 = vor.u32 %v2613_v23, %v2598_v20  ;;  %v2390_v61 = vmov 0.0|0.0  }
 0x1a7   : > { %v2024_v27 = vld [vmem:[#allocation2] sm:$0xff]  ;;  %v2023_v9 = vld [vmem:[#allocation2 + $0x30] sm:$0xff]  ;;  %v2038_v18 = vld [vmem:[#allocation6 + $0x38] sm:$0xff]  ;;  %v1814_v32 = vor.u32 %v2719_v47, %v2706_v44 }
 0x1a8   : > { %1046 = vmatpush.bf16.msra.mxu1 %v2038_v18  ;;  %v2037_v36 = vld [vmem:[#allocation6 + $0x30] sm:$0xff]  ;;  %2174 = vmatpush.bf16.msra.mxu3 %v2038_v18  ;;  %v2036_v2 = vld [vmem:[#allocation6 + $0x28] sm:$0xff]  ;;  %v2035_v5 = vld [vmem:[#allocation6 + $0x20] sm:$0xff] }
 0x1a9   : > { %v2034_v11 = vld [vmem:[#allocation6 + $0x18] sm:$0xff]  ;;  %v2033_v35 = vld [vmem:[#allocation6 + $0x10] sm:$0xff]  ;;  %v2032_v14 = vld [vmem:[#allocation6 + $0x8] sm:$0xff] }
 0x1aa   : > { %924 = vmatpush.bf16.msra.mxu0 %v2029_v62  ;;  %2167 = vmatpush.bf16.msra.mxu2 %v2029_v62  ;;  %v2031_v17 = vld [vmem:[#allocation6] sm:$0xff]  ;;  %v2103_v62 = vunpack.c.l.bf16 %v2390_v61 }
 0x1ac   : > { %1047 = vmatpush.bf16.msra.mxu1 %v2037_v36  ;;  %2175 = vmatpush.bf16.msra.mxu3 %v2037_v36 }
 0x1ae   : > { %925 = vmatpush.bf16.msra.mxu0 %v2028_v63  ;;  %2168 = vmatpush.bf16.msra.mxu2 %v2028_v63  ;;  %v2109_v63 = vpack.c.bf16 %v2103_v62, %v2103_v62 }
 0x1b0   : > { %1048 = vmatpush.bf16.msra.mxu1 %v2036_v2  ;;  %2176 = vmatpush.bf16.msra.mxu3 %v2036_v2  ;;  %2144 = vst [vmem:[#allocation3 + $0x10] sm:$0xff] %v2109_v63  }
 0x1b1   : > { %2145 = vst [vmem:[#allocation3 + $0x20] sm:$0xff] %v2109_v63  }
 0x1b2   : > { %926 = vmatpush.bf16.msra.mxu0 %v2027_v0  ;;  %2169 = vmatpush.bf16.msra.mxu2 %v2027_v0  ;;  %2146 = vst [vmem:[#allocation3 + $0x28] sm:$0xff] %v2109_v63  }
 0x1b3   : > { %2147 = vst [vmem:[#allocation3 + $0x8] sm:$0xff] %v2109_v63  }
 0x1b4   : > { %1049 = vmatpush.bf16.msra.mxu1 %v2035_v5  ;;  %2177 = vmatpush.bf16.msra.mxu3 %v2035_v5  ;;  %2148 = vst [vmem:[#allocation3 + $0x30] sm:$0xff] %v2109_v63  }
 0x1b5   : > { %2149 = vst [vmem:[#allocation3 + $0x38] sm:$0xff] %v2109_v63  }
 0x1b6   : > { %927 = vmatpush.bf16.msra.mxu0 %v2026_v3  ;;  %2170 = vmatpush.bf16.msra.mxu2 %v2026_v3  ;;  %v2259_v3 = vld [vmem:[%s2829_s5 + $0x1] ss:$0 sm:$0xff] }
 0x1b8   : > { %1050 = vmatpush.bf16.msra.mxu1 %v2034_v11  ;;  %2178 = vmatpush.bf16.msra.mxu3 %v2034_v11 }
 0x1ba   : > { %928 = vmatpush.bf16.msra.mxu0 %v2025_v6  ;;  %2171 = vmatpush.bf16.msra.mxu2 %v2025_v6 }
 0x1bc   : > { %1051 = vmatpush.bf16.msra.mxu1 %v2033_v35  ;;  %2179 = vmatpush.bf16.msra.mxu3 %v2033_v35 }
 0x1be   : > { %929 = vmatpush.bf16.msra.mxu0 %v2024_v27  ;;  %2172 = vmatpush.bf16.msra.mxu2 %v2024_v27 }
 0x1c0   : > { %1052 = vmatpush.bf16.msra.mxu1 %v2032_v14  ;;  %2180 = vmatpush.bf16.msra.mxu3 %v2032_v14 }
 0x1c2   : > { %930 = vmatpush.bf16.msra.mxu0 %v2023_v9  ;;  %2173 = vmatpush.bf16.msra.mxu2 %v2023_v9 }
 0x1c4   : > { %1053 = vmatpush.bf16.msra.mxu1 %v2031_v17  ;;  %2181 = vmatpush.bf16.msra.mxu3 %v2031_v17 }
 0x1c5   : > { %931 = vmatmul.bf16.vlgmr.msra.gmra.mxu0 %v1786_v12  ;;  %951 = vmatmul.bf16.vlgmr.msra.gmra.mxu2 %v1802_v30 }
 0x1d5   : > { %936 = vmatmul.bf16.gmra.mxu0 %v1790_v33  ;;  %956 = vmatmul.bf16.gmra.mxu2 %v1806_v15 }
 0x1e5   : > { %941 = vmatmul.bf16.gmra.mxu0 %v1794_v26  ;;  %961 = vmatmul.bf16.gmra.mxu2 %v1810_v8 }
 0x1f5   : > { %946 = vmatmul.bf16.gmra.mxu0 %v1798_v29  ;;  %966 = vmatmul.bf16.gmra.mxu2 %v1814_v32 }
 0x242   : > { %v932_v38 = vpop.f32.mrf.mxu0 }
 0x248   : > { %v952_v41 = vpop.f32.mrf.mxu2 }
 0x24a   : > { %v934_v39 = vpop.f32.mrf.mxu0 }
 0x24b   : > { %v972_v42 = vpack.c.bf16 %v934_v39, %v932_v38 }
 0x24d   : > { %1054 = vmatmul.bf16.vlgmr.msra.gmra.mxu1 %v972_v42 }
 0x250   : > { %v954_v20 = vpop.f32.mrf.mxu2 }
 0x251   : > { %v976_v23 = vpack.c.bf16 %v954_v20, %v952_v41 }
 0x252   : > { %v937_v49 = vpop.f32.mrf.mxu0 }
 0x253   : > { %1074 = vmatmul.bf16.vlgmr.msra.gmra.mxu3 %v976_v23 }
 0x258   : > { %v957_v44 = vpop.f32.mrf.mxu2 }
 0x25a   : > { %v939_v47 = vpop.f32.mrf.mxu0 }
 0x25b   : > { %v973_v50 = vpack.c.bf16 %v939_v47, %v937_v49 }
 0x25d   : > { %1059 = vmatmul.bf16.gmra.mxu1 %v973_v50 }
 0x260   : > { %v959_v21 = vpop.f32.mrf.mxu2 }
 0x261   : > { %v977_v24 = vpack.c.bf16 %v959_v21, %v957_v44 }
 0x262   : > { %v942_v45 = vpop.f32.mrf.mxu0 }
 0x263   : > { %1079 = vmatmul.bf16.gmra.mxu3 %v977_v24 }
 0x268   : > { %v962_v48 = vpop.f32.mrf.mxu2 }
 0x26a   : > { %v944_v51 = vpop.f32.mrf.mxu0 }
 0x26b   : > { %v974_v52 = vpack.c.bf16 %v944_v51, %v942_v45 }
 0x26d   : > { %1064 = vmatmul.bf16.gmra.mxu1 %v974_v52 }
 0x270   : > { %v964_v53 = vpop.f32.mrf.mxu2 }
 0x271   : > { %v978_v54 = vpack.c.bf16 %v964_v53, %v962_v48 }
 0x272   : > { %v947_v55 = vpop.f32.mrf.mxu0 }
 0x273   : > { %1084 = vmatmul.bf16.gmra.mxu3 %v978_v54 }
 0x278   : > { %v967_v56 = vpop.f32.mrf.mxu2 }
 0x27a   : > { %v949_v57 = vpop.f32.mrf.mxu0 }
 0x27b   : > { %v975_v58 = vpack.c.bf16 %v949_v57, %v947_v55 }
 0x27d   : > { %1069 = vmatmul.bf16.gmra.mxu1 %v975_v58 }
 0x280   : > { %v969_v59 = vpop.f32.mrf.mxu2 }
 0x281   : > { %v979_v60 = vpack.c.bf16 %v969_v59, %v967_v56 }
 0x283   : > { %1089 = vmatmul.bf16.gmra.mxu3 %v979_v60 }
 0x2ca   : > { %v1055_v0 = vpop.f32.mrf.mxu1 }
 0x2cb   : > { %v1056_v6 = vadd.f32 %v2259_v3, %v1055_v0 }
 0x2cd   : > { %v1095_v12 = vmax.f32 %v1056_v6, 0.0 }
 0x2d2   : > { %v1057_v27 = vpop.f32.mrf.mxu1 }
 0x2d3   : > { %v1058_v9 = vadd.f32 %v2259_v3, %v1057_v27 }
 0x2d5   : > { %v1096_v30 = vmax.f32 %v1058_v9, 0.0 }
 0x2d6   : > { %v1075_v33 = vpop.f32.mrf.mxu3 }
 0x2d7   : > { %v2099_v15 = vpack.c.bf16 %v1096_v30, %v1095_v12 }
 0x2d9   : > { %2100 = vst [vmem:[#allocation3] sm:$0xff] %v2099_v15  }
 0x2da   : > { %v1060_v18 = vpop.f32.mrf.mxu1 }
 0x2db   : > { %v1061_v36 = vadd.f32 %v2259_v3, %v1060_v18 }
 0x2dd   : > { %v1097_v2 = vmax.f32 %v1061_v36, 0.0 }
 0x2de   : > { %v1077_v5 = vpop.f32.mrf.mxu3 }
 0x2df   : > { %v2104_v26 = vpack.c.bf16 %v2103_v62, %v1097_v2 }
 0x2e1   : > { %2143 = vst [vmem:[#allocation3 + $0x18] sm:$0xff] %v2104_v26  }
 0x2e2   : > { %v1062_v8 = vpop.f32.mrf.mxu1 }
 0x2e6   : > { %v1080_v11 = vpop.f32.mrf.mxu3 }
 0x2ea   : > { %v1065_v29 = vpop.f32.mrf.mxu1 }
 0x2ee   : > { %v1082_v32 = vpop.f32.mrf.mxu3 }
 0x2f2   : > { %v1067_v35 = vpop.f32.mrf.mxu1 }
 0x2f6   : > { %v1085_v14 = vpop.f32.mrf.mxu3 }
 0x2fa   : > { %v1070_v17 = vpop.f32.mrf.mxu1 }
 0x2fe   : > { %v1087_v38 = vpop.f32.mrf.mxu3 }
 0x302   : > { %v1072_v41 = vpop.f32.mrf.mxu1 }
 0x306   : > { %v1090_v39 = vpop.f32.mrf.mxu3 }
 0x30e   : > { %v1092_v42 = vpop.f32.mrf.mxu3 }
 0x30f PF: > { %p1879_p10 = scmp.ne.s32.totalorder %s2373_s24, 2 }
 0x311   : > { %1198 = sbr.rel (%p1879_p10) target bundleno = 1256 (0x4e8), region = 76 }
 0x316   : > { %v2046_v20 = vld [vmem:[#allocation3 + $0x38] sm:$0xff]  ;;  %v2045_v23 = vld [vmem:[#allocation3 + $0x30] sm:$0xff]  ;;  %v2044_v49 = vld [vmem:[#allocation3 + $0x8] sm:$0xff]  ;;  %v1883_v45 = vor.u32 %v2518_v4, %v2503_v1  ;;  %v1887_v48 = vor.u32 %v2548_v10, %v2533_v7  ;;  %v1899_v52 = vor.u32 %v2636_v28, %v2623_v25  ;;  %v1891_v4 = vor.u32 %v2578_v16, %v2563_v13 }
 0x317   : > { %1311 = vmatpush.bf16.msra.mxu0 %v2046_v20  ;;  %2182 = vmatpush.bf16.msra.mxu3 %v2046_v20  ;;  %v2043_v44 = vld [vmem:[#allocation3 + $0x28] sm:$0xff]  ;;  %v2042_v47 = vld [vmem:[#allocation3 + $0x20] sm:$0xff]  ;;  %v2041_v50 = vld [vmem:[#allocation3 + $0x10] sm:$0xff]  ;;  %v1895_v10 = vor.u32 %v2608_v22, %v2593_v19  ;;  %v1903_v25 = vor.u32 %v2662_v34, %v2649_v31  ;;  %v1907_v28 = vor.u32 %v2688_v40, %v2675_v37 }
 0x318   : > { %v2040_v21 = vld [vmem:[#allocation3 + $0x18] sm:$0xff]  ;;  %v2039_v24 = vld [vmem:[#allocation3] sm:$0xff]  ;;  %v2053_v53 = vld [vmem:[#allocation8 + $0x30] sm:$0xff]  ;;  %v1911_v13 = vor.u32 %v2714_v46, %v2701_v43 }
 0x319   : > { %v2054_v51 = vld [vmem:[#allocation8 + $0x38] sm:$0xff]  ;;  %v2052_v54 = vld [vmem:[#allocation8 + $0x28] sm:$0xff]  ;;  %v2051_v1 = vld [vmem:[#allocation8 + $0x20] sm:$0xff] }
 0x31a   : > { %1434 = vmatpush.bf16.msra.mxu1 %v2054_v51  ;;  %2190 = vmatpush.bf16.msra.mxu2 %v2054_v51  ;;  %v2050_v7 = vld [vmem:[#allocation8 + $0x18] sm:$0xff]  ;;  %v2049_v16 = vld [vmem:[#allocation8 + $0x10] sm:$0xff]  ;;  %v2048_v55 = vld [vmem:[#allocation8 + $0x8] sm:$0xff] }
 0x31b   : > { %1312 = vmatpush.bf16.msra.mxu0 %v2045_v23  ;;  %2183 = vmatpush.bf16.msra.mxu3 %v2045_v23  ;;  %v2047_v19 = vld [vmem:[#allocation8] sm:$0xff] }
 0x31c   : > { %v2260_v2 = vld [vmem:[%s2829_s5 + $0x2] ss:$0 sm:$0xff] }
 0x31d   : > { %v2055_v41 = vld [vmem:[%s2830_s6] sm:$0xff] }
 0x31e   : > { %1435 = vmatpush.bf16.msra.mxu1 %v2053_v53  ;;  %2191 = vmatpush.bf16.msra.mxu2 %v2053_v53  ;;  %v1555_v51 = vld [vmem:[%s2831_s7] sm:$0xff] }
 0x31f   : > { %1313 = vmatpush.bf16.msra.mxu0 %v2044_v49  ;;  %2184 = vmatpush.bf16.msra.mxu3 %v2044_v49 }
 0x322   : > { %1436 = vmatpush.bf16.msra.mxu1 %v2052_v54  ;;  %2192 = vmatpush.bf16.msra.mxu2 %v2052_v54  ;;  %v1556_v54 = vld [vmem:[%s2831_s7 + $0x8] sm:$0xff] }
 0x323   : > { %1314 = vmatpush.bf16.msra.mxu0 %v2043_v44  ;;  %2185 = vmatpush.bf16.msra.mxu3 %v2043_v44 }
 0x326   : > { %1437 = vmatpush.bf16.msra.mxu1 %v2051_v1  ;;  %2193 = vmatpush.bf16.msra.mxu2 %v2051_v1 }
 0x327   : > { %1315 = vmatpush.bf16.msra.mxu0 %v2042_v47  ;;  %2186 = vmatpush.bf16.msra.mxu3 %v2042_v47 }
 0x32a   : > { %1438 = vmatpush.bf16.msra.mxu1 %v2050_v7  ;;  %2194 = vmatpush.bf16.msra.mxu2 %v2050_v7 }
 0x32b   : > { %1316 = vmatpush.bf16.msra.mxu0 %v2041_v50  ;;  %2187 = vmatpush.bf16.msra.mxu3 %v2041_v50 }
 0x32e   : > { %1439 = vmatpush.bf16.msra.mxu1 %v2049_v16  ;;  %2195 = vmatpush.bf16.msra.mxu2 %v2049_v16 }
 0x32f   : > { %1317 = vmatpush.bf16.msra.mxu0 %v2040_v21  ;;  %2188 = vmatpush.bf16.msra.mxu3 %v2040_v21 }
 0x332   : > { %1440 = vmatpush.bf16.msra.mxu1 %v2048_v55  ;;  %2196 = vmatpush.bf16.msra.mxu2 %v2048_v55 }
 0x333   : > { %1318 = vmatpush.bf16.msra.mxu0 %v2039_v24  ;;  %2189 = vmatpush.bf16.msra.mxu3 %v2039_v24 }
 0x336   : > { %1319 = vmatmul.bf16.vlgmr.msra.gmra.mxu0 %v1883_v45  ;;  %1339 = vmatmul.bf16.vlgmr.msra.gmra.mxu3 %v1899_v52 }
 0x337   : > { %1441 = vmatpush.bf16.msra.mxu1 %v2047_v19  ;;  %2197 = vmatpush.bf16.msra.mxu2 %v2047_v19 }
 0x346   : > { %1324 = vmatmul.bf16.gmra.mxu0 %v1887_v48  ;;  %1344 = vmatmul.bf16.gmra.mxu3 %v1903_v25 }
 0x356   : > { %1329 = vmatmul.bf16.gmra.mxu0 %v1891_v4  ;;  %1349 = vmatmul.bf16.gmra.mxu3 %v1907_v28 }
 0x366   : > { %1334 = vmatmul.bf16.gmra.mxu0 %v1895_v10  ;;  %1354 = vmatmul.bf16.gmra.mxu3 %v1911_v13 }
 0x3b3   : > { %v1320_v22 = vpop.f32.mrf.mxu0 }
 0x3b9   : > { %v1340_v43 = vpop.f32.mrf.mxu3 }
 0x3bb   : > { %v1322_v31 = vpop.f32.mrf.mxu0 }
 0x3bc   : > { %v1360_v34 = vpack.c.bf16 %v1322_v31, %v1320_v22 }
 0x3be   : > { %1442 = vmatmul.bf16.vlgmr.msra.gmra.mxu1 %v1360_v34 }
 0x3c1   : > { %v1342_v60 = vpop.f32.mrf.mxu3 }
 0x3c2   : > { %v1364_v6 = vpack.c.bf16 %v1342_v60, %v1340_v43 }
 0x3c3   : > { %v1325_v56 = vpop.f32.mrf.mxu0 }
 0x3c9   : > { %v1345_v63 = vpop.f32.mrf.mxu3 }
 0x3cb   : > { %v1327_v37 = vpop.f32.mrf.mxu0 }
 0x3cc   : > { %v1361_v40 = vpack.c.bf16 %v1327_v37, %v1325_v56 }
 0x3ce   : > { %1447 = vmatmul.bf16.gmra.mxu1 %v1361_v40 }
 0x3d1   : > { %v1347_v0 = vpop.f32.mrf.mxu3 }
 0x3d2   : > { %v1365_v3 = vpack.c.bf16 %v1347_v0, %v1345_v63 }
 0x3d3   : > { %v1330_v57 = vpop.f32.mrf.mxu0 }
 0x3d4   : > { %1467 = vmatmul.bf16.vlgmr.msra.gmra.mxu2 %v1365_v3 }
 0x3d9   : > { %v1350_v27 = vpop.f32.mrf.mxu3 }
 0x3db   : > { %v1332_v46 = vpop.f32.mrf.mxu0 }
 0x3dc   : > { %v1362_v58 = vpack.c.bf16 %v1332_v46, %v1330_v57 }
 0x3de   : > { %1452 = vmatmul.bf16.gmra.mxu1 %v1362_v58 }
 0x3e1   : > { %v1352_v9 = vpop.f32.mrf.mxu3 }
 0x3e2   : > { %v1366_v12 = vpack.c.bf16 %v1352_v9, %v1350_v27 }
 0x3e3   : > { %v1335_v59 = vpop.f32.mrf.mxu0 }
 0x3e4   : > { %1472 = vmatmul.bf16.gmra.mxu2 %v1366_v12 }
 0x3e9   : > { %v1355_v30 = vpop.f32.mrf.mxu3 }
 0x3eb   : > { %v1337_v61 = vpop.f32.mrf.mxu0 }
 0x3ec   : > { %v1363_v62 = vpack.c.bf16 %v1337_v61, %v1335_v59 }
 0x3ee   : > { %1457 = vmatmul.bf16.gmra.mxu1 %v1363_v62 }
 0x3f1   : > { %v1357_v33 = vpop.f32.mrf.mxu3 }
 0x3f2   : > { %v1367_v15 = vpack.c.bf16 %v1357_v33, %v1355_v30 }
 0x3f4   : > { %1477 = vmatmul.bf16.gmra.mxu2 %v1367_v15 }
 0x3fe   : > { %1462 = vmatmul.bf16.gmra.mxu1 %v1364_v6 }
 0x43b   : > { %v1443_v18 = vpop.f32.mrf.mxu1 }
 0x43c   : > { %v1444_v11 = vadd.f32 %v2260_v2, %v1443_v18 }
 0x43e   : > { %v1483_v14 = vmax.f32 %v1444_v11, 0.0 }
 0x443   : > { %v1445_v36 = vpop.f32.mrf.mxu1 }
 0x444   : > { %v1446_v26 = vadd.f32 %v2260_v2, %v1445_v36 }
 0x446   : > { %v1484_v32 = vmax.f32 %v1446_v26, 0.0 }
 0x448   : > { %v1547_v38 = vpack.c.bf16 %v1484_v32, %v1483_v14 }
 0x44b   : > { %v1448_v5 = vpop.f32.mrf.mxu1 }
 0x44c   : > { %v1449_v8 = vadd.f32 %v2260_v2, %v1448_v5 }
 0x44e   : > { %v1485_v29 = vmax.f32 %v1449_v8, 0.0 }
 0x450   : > { %v1548_v35 = vpack.c.bf16 0.0, %v1485_v29 }
 0x452   : > { %1571 = vmatpush.bf16.msrb.mxu2 %v1548_v35 }
 0x453   : > { %v1450_v17 = vpop.f32.mrf.mxu1 }
 0x456   : > { %1572 = vmatpush.bf16.msrb.mxu2 %v1547_v38 }
 0x457   : > { %v1468_v44 = vpop.f32.mrf.mxu2 }
 0x459   : > { %1573 = vmatmul.bf16.vlgmr.msrb.gmra.mxu2 %v2055_v41 }
 0x45b   : > { %v1453_v39 = vpop.f32.mrf.mxu1 }
 0x45f   : > { %v1470_v50 = vpop.f32.mrf.mxu2 }
 0x463   : > { %v1455_v42 = vpop.f32.mrf.mxu1 }
 0x467   : > { %v1473_v21 = vpop.f32.mrf.mxu2 }
 0x46b   : > { %v1458_v20 = vpop.f32.mrf.mxu1 }
 0x46f   : > { %v1475_v24 = vpop.f32.mrf.mxu2 }
 0x473   : > { %v1460_v23 = vpop.f32.mrf.mxu1 }
 0x477   : > { %v1478_v45 = vpop.f32.mrf.mxu2 }
 0x47b   : > { %v1463_v49 = vpop.f32.mrf.mxu1 }
 0x47f   : > { %v1480_v48 = vpop.f32.mrf.mxu2 }
 0x483   : > { %v1465_v47 = vpop.f32.mrf.mxu1 }
 0x4dc   : > { %v1574_v52 = vpop.f32.mrf.mxu2 }
 0x4dd   : > { %v1579_v53 = vadd.f32 %v1574_v52, %v1555_v51 }
 0x4df   : > { %1581 = vst [vmem:[%s2831_s7] sm:$0xff] %v1579_v53 }
 0x4e4   : > { %v1576_v1 = vpop.f32.mrf.mxu2 }
 0x4e5   : > { %v1580_v4 = vadd.f32 %v1576_v1, %v1556_v54 }
 0x4e7   : > { %1582 = vst [vmem:[%s2831_s7 + $0x8] sm:$0xff] %v1580_v4 }
 0x4e8 PF: > { %s19_s26 = sadd.s32 1, %s2381_s26   ;;  %s2835_s24 = smov %s2377_s25 }
 0x4e9   : > { %p16_p11 = scmp.ge.s32.totalorder %s19_s26, 5   ;;  %s2836_s25 = smov %s2838_s13 }
 0x4eb   :  { %18 = sbr.rel (!%p16_p11) target bundleno = 3 (0x3), region = 108 }
 0x4f0   :  { %1594 = vsyncpa [#allocation5], 1 }
 0x4f1   :  { %1596 = vsyncpa [#allocation5 + $0x1], 1 }
 0x4f2   :  { %1597 = vsyncpa [#allocation7], 1 }

</bundles_post_ra>
